<compile_context>
chip_gen: v5e
topology: v5e:2x2
jax: 0.10.0
libtpu: 0.0.40
codegen_flags: <defaults>
</compile_context>

<pallas_src>
import functools

import jax
import jax.numpy as jnp
from jax import lax
from jax.experimental import pallas as pl
from jax.experimental.pallas import tpu as pltpu


def _fc_kernel(x_ref, w_ref, b_ref, o_ref, acc_ref, *, apply_relu):
    # x_ref:   (tm, tk)  input tile (compute dtype, e.g. bf16)
    # w_ref:   (tn, tk)  weight tile, PyTorch (N, K) layout (no HBM transpose)
    # b_ref:   (1, tn)   bias slice (f32)
    # o_ref:   (tm, tn)  output tile
    # acc_ref: (tm, tn)  f32 VMEM accumulator, resident across the K grid axis
    k = pl.program_id(2)

    @pl.when(k == 0)
    def _init():
        acc_ref[...] = jnp.zeros_like(acc_ref)

    # (tm, tk) x (tn, tk) contracted along K -> (tm, tn), f32 accumulation on MXU.
    acc_ref[...] += lax.dot_general(
        x_ref[...],
        w_ref[...],
        dimension_numbers=(((1,), (1,)), ((), ())),
        preferred_element_type=jnp.float32,
    )

    @pl.when(k == pl.num_programs(2) - 1)
    def _finalize():
        out = acc_ref[...] + b_ref[...].astype(jnp.float32)
        if apply_relu:
            out = jnp.maximum(out, 0.0)
        o_ref[...] = out.astype(o_ref.dtype)


def _pick_tile(dim, target, align):
    """Largest multiple of `align` <= `target` that divides `dim`; else full extent.

    Full-extent blocks are exempt from the (8,128) divisibility rule, and
    divisor tiles guarantee no partial edge blocks (important for the K axis)."""
    if dim <= target:
        return dim
    t = (target // align) * align
    while t >= align:
        if dim % t == 0:
            return t
        t -= align
    return dim


def fc_forward(x, weight, bias, relu=True, *,
               tm=None, tn=None, tk=None, compute_dtype=jnp.bfloat16):
    """Pallas equivalent of FC.forward (y = x @ W^T + b, optional ReLU).

    x:      (M, K)
    weight: (N, K)   PyTorch nn.Linear layout (consumed directly, no transpose)
    bias:   (N,)
    compute_dtype: dtype fed to the MXU (bf16 default, f32 accumulation);
                   pass jnp.float32 (or None) for exact-f32 numerics.
    """
    M, K = x.shape
    N, Kw = weight.shape
    assert K == Kw, (K, Kw)
    assert bias.shape == (N,), bias.shape

    out_dtype = x.dtype

    if compute_dtype is not None and x.dtype != compute_dtype:
        x = x.astype(compute_dtype)
    if compute_dtype is not None and weight.dtype != compute_dtype:
        weight = weight.astype(compute_dtype)

    b2 = bias.reshape(1, N).astype(jnp.float32)  # lane-dense broadcast row

    # MXU / pipeline friendly defaults (VMEM-safe on v5e/v6e/v7x even
    # double-buffered: bf16 256x1024 + 512x1024 + f32 256x512 acc ~= 2 MiB).
    tm = tm or _pick_tile(M, 256, 8)
    tn = tn or _pick_tile(N, 512, 128)
    tk = tk or _pick_tile(K, 1024, 128)
    assert M % tm == 0 and N % tn == 0 and K % tk == 0, (tm, tn, tk)

    grid = (M // tm, N // tn, K // tk)

    kernel = functools.partial(_fc_kernel, apply_relu=relu)

    itemsize_in = jnp.dtype(x.dtype).itemsize
    cost = pl.CostEstimate(
        flops=2 * M * N * K,
        transcendentals=0,
        bytes_accessed=(M * K + N * K) * itemsize_in
        + N * 4
        + M * N * jnp.dtype(out_dtype).itemsize,
    )

    return pl.pallas_call(
        kernel,
        out_shape=jax.ShapeDtypeStruct((M, N), out_dtype),
        grid_spec=pltpu.PrefetchScalarGridSpec(
            num_scalar_prefetch=0,
            grid=grid,
            in_specs=[
                pl.BlockSpec((tm, tk), lambda i, j, k: (i, k)),   # x tile
                pl.BlockSpec((tn, tk), lambda i, j, k: (j, k)),   # W tile, (N, K) layout
                pl.BlockSpec((1, tn), lambda i, j, k: (0, j)),    # bias slice
            ],
            out_specs=pl.BlockSpec((tm, tn), lambda i, j, k: (i, j)),
            scratch_shapes=[pltpu.VMEM((tm, tn), jnp.float32)],
        ),
        compiler_params=pltpu.CompilerParams(
            dimension_semantics=("parallel", "parallel", "arbitrary"),
        ),
        cost_estimate=cost,
    )(x, weight, b2)


def init_fc_params(key, in_features, out_features):
    """Matches FC.__init__: xavier-normal weight, PyTorch-default uniform bias."""
    kw, kb = jax.random.split(key)
    std = (2.0 / (in_features + out_features)) ** 0.5
    weight = std * jax.random.normal(kw, (out_features, in_features), dtype=jnp.float32)
    bound = 1.0 / (in_features ** 0.5)
    bias = jax.random.uniform(
        kb, (out_features,), minval=-bound, maxval=bound, dtype=jnp.float32
    )
    return weight, bias


def _ref_bf16(x, weight, bias, relu):
    """Reference with the same bf16-inputs / f32-accumulate numerics."""
    y = lax.dot_general(
        x.astype(jnp.bfloat16),
        weight.astype(jnp.bfloat16),
        dimension_numbers=(((1,), (1,)), ((), ())),
        preferred_element_type=jnp.float32,
    ) + bias
    return jnp.maximum(y, 0.0) if relu else y


if __name__ == "__main__":
    key = jax.random.PRNGKey(0)
    k_x, k_p, k_x2, k_p2 = jax.random.split(key, 4)

    # Small shapes consistent with the module's forward.
    batch, in_features, out_features = 8, 32, 64
    x = jax.random.normal(k_x, (batch, in_features), dtype=jnp.float32)
    weight, bias = init_fc_params(k_p, in_features, out_features)

    # Default bf16-matmul path.
    out = fc_forward(x, weight, bias, relu=True)
    jax.block_until_ready(out)
    assert out.shape == (batch, out_features)
    assert jnp.allclose(out, _ref_bf16(x, weight, bias, True), atol=1e-4, rtol=1e-4)

    # Exact-f32 fallback path vs. the PyTorch-style reference.
    out_f32 = fc_forward(x, weight, bias, relu=True, compute_dtype=jnp.float32)
    jax.block_until_ready(out_f32)
    ref_f32 = jnp.maximum(x @ weight.T + bias, 0.0)
    assert jnp.allclose(out_f32, ref_f32, atol=1e-5, rtol=1e-5)

    # Multi-tile path: exercises the K-grid accumulator and (8,128)-aligned tiles.
    m2, kdim2, n2 = 16, 256, 256
    x2 = jax.random.normal(k_x2, (m2, kdim2), dtype=jnp.float32)
    w2, b2 = init_fc_params(k_p2, kdim2, n2)
    out2 = fc_forward(x2, w2, b2, relu=True, tm=8, tn=128, tk=128)
    jax.block_until_ready(out2)
    assert jnp.allclose(out2, _ref_bf16(x2, w2, b2, True), atol=5e-3, rtol=5e-3)

    print("KERNEL_OK")
</pallas_src>

<mosaic_0001>
module attributes {stable_mosaic.version = 11 : i64} {
  func.func @_fc_kernel(%arg0: i32, %arg1: i32, %arg2: i32, %arg3: memref<8x32xbf16, #tpu.memory_space<vmem>>, %arg4: memref<64x32xbf16, #tpu.memory_space<vmem>>, %arg5: memref<1x64xf32, #tpu.memory_space<vmem>>, %arg6: memref<8x64xf32, #tpu.memory_space<vmem>>, %arg7: memref<8x64xf32, #tpu.memory_space<vmem>>) attributes {dimension_semantics = [#tpu.dimension_semantics<parallel>, #tpu.dimension_semantics<parallel>, #tpu.dimension_semantics<arbitrary>], iteration_bounds = array<i64: 1, 1, 1>, scalar_prefetch = 0 : i64, scratch_operands = 1 : i64, tpu.core_type = #tpu.core_type<tc>, window_params = [{transform_indices = @transform_0, window_bounds = array<i64: 8, 32>}, {transform_indices = @transform_1, window_bounds = array<i64: 64, 32>}, {transform_indices = @transform_2, window_bounds = array<i64: 1, 64>}, {transform_indices = @transform_3, window_bounds = array<i64: 8, 64>}]} {
    %c0_i32 = arith.constant 0 : i32
    %0 = arith.cmpi eq, %arg2, %c0_i32 : i32
    %1 = arith.extui %0 : i1 to i32
    %c0_i32_0 = arith.constant 0 : i32
    %2 = arith.cmpi ne, %1, %c0_i32_0 : i32
    scf.if %2 {
      %cst_10 = arith.constant 0.000000e+00 : f32
      %12 = vector.broadcast %cst_10 : f32 to vector<8x64xf32>
      %c0_11 = arith.constant 0 : index
      %c0_12 = arith.constant 0 : index
      %13 = vector.load %arg7[%c0_11, %c0_12] : memref<8x64xf32, #tpu.memory_space<vmem>>, vector<8x64xf32>
      tpu.vector_store %arg7[%c0_11, %c0_12], %12 {strides = array<i32>} : memref<8x64xf32, #tpu.memory_space<vmem>>, vector<8x64xf32>,
    } else {
    }
    %c0 = arith.constant 0 : index
    %c0_1 = arith.constant 0 : index
    %3 = vector.load %arg7[%c0, %c0_1] : memref<8x64xf32, #tpu.memory_space<vmem>>, vector<8x64xf32>
    %c0_2 = arith.constant 0 : index
    %c0_3 = arith.constant 0 : index
    %4 = vector.load %arg3[%c0_2, %c0_3] : memref<8x32xbf16, #tpu.memory_space<vmem>>, vector<8x32xbf16>
    %c0_4 = arith.constant 0 : index
    %c0_5 = arith.constant 0 : index
    %5 = vector.load %arg4[%c0_4, %c0_5] : memref<64x32xbf16, #tpu.memory_space<vmem>>, vector<64x32xbf16>
    %cst = arith.constant dense<0.000000e+00> : vector<8x64xf32>
    %6 = tpu.matmul %4, %5, %cst {dimension_numbers = #tpu.dot_dimension_numbers<[1], [1], [0], [0], [0, 0, 1, 0], [], []>} : vector<8x32xbf16>, vector<64x32xbf16>, vector<8x64xf32> -> vector<8x64xf32>
    %7 = arith.addf %3, %6 : vector<8x64xf32>
    %c0_6 = arith.constant 0 : index
    %c0_7 = arith.constant 0 : index
    %8 = vector.load %arg7[%c0_6, %c0_7] : memref<8x64xf32, #tpu.memory_space<vmem>>, vector<8x64xf32>
    tpu.vector_store %arg7[%c0_6, %c0_7], %7 {strides = array<i32>} : memref<8x64xf32, #tpu.memory_space<vmem>>, vector<8x64xf32>,
    %c0_i32_8 = arith.constant 0 : i32
    %9 = arith.cmpi eq, %arg2, %c0_i32_8 : i32
    %10 = arith.extui %9 : i1 to i32
    %c0_i32_9 = arith.constant 0 : i32
    %11 = arith.cmpi ne, %10, %c0_i32_9 : i32
    scf.if %11 {
      %c0_10 = arith.constant 0 : index
      %c0_11 = arith.constant 0 : index
      %12 = vector.load %arg7[%c0_10, %c0_11] : memref<8x64xf32, #tpu.memory_space<vmem>>, vector<8x64xf32>
      %c0_12 = arith.constant 0 : index
      %c0_13 = arith.constant 0 : index
      %13 = vector.load %arg5[%c0_12, %c0_13] : memref<1x64xf32, #tpu.memory_space<vmem>>, vector<1x64xf32>
      %14 = vector.broadcast %13 : vector<1x64xf32> to vector<8x64xf32>
      %15 = arith.addf %12, %14 : vector<8x64xf32>
      %cst_14 = arith.constant 0.000000e+00 : f32
      %16 = vector.broadcast %cst_14 : f32 to vector<8x64xf32>
      %17 = arith.maximumf %15, %16 : vector<8x64xf32>
      %c0_15 = arith.constant 0 : index
      %c0_16 = arith.constant 0 : index
      %18 = vector.load %arg6[%c0_15, %c0_16] : memref<8x64xf32, #tpu.memory_space<vmem>>, vector<8x64xf32>
      tpu.vector_store %arg6[%c0_15, %c0_16], %17 {strides = array<i32>} : memref<8x64xf32, #tpu.memory_space<vmem>>, vector<8x64xf32>,
    } else {
    }
    return
  }
  func.func @transform_0(%arg0: i32, %arg1: i32, %arg2: i32) -> (i32, i32) {
    %c0_i32 = arith.constant 0 : i32
    return %arg0, %arg2 : i32, i32
  }
  func.func @transform_1(%arg0: i32, %arg1: i32, %arg2: i32) -> (i32, i32) {
    %c0_i32 = arith.constant 0 : i32
    return %arg1, %arg2 : i32, i32
  }
  func.func @transform_2(%arg0: i32, %arg1: i32, %arg2: i32) -> (i32, i32) {
    %c0_i32 = arith.constant 0 : i32
    %c0_i32_0 = arith.constant 0 : i32
    return %c0_i32, %arg1 : i32, i32
  }
  func.func @transform_3(%arg0: i32, %arg1: i32, %arg2: i32) -> (i32, i32) {
    %c0_i32 = arith.constant 0 : i32
    return %arg0, %arg1 : i32, i32
  }
}

</mosaic_0001>

<bundles_post_ra>
// kernel: tpu_custom_call.1
= control target key start
LH: loop header
LB: loop body
LE: loop exit
PB: predicated region body
PF: predicated region fallthrough
CT: control target
= control target key end

     0   :  { %vm52_vm0 = vcmask 261120   ;;  %s212_s0 = inlined_call_operand.vmem [shape: bf16[8,32], index: 0, kind: input, shape index: {}]   ;;  %s213_s1 = inlined_call_operand.vmem [shape: bf16[64,32], index: 1, kind: input, shape index: {}]   ;;  %s214_s2 = inlined_call_operand.vmem [shape: f32[1,64], index: 2, kind: input, shape index: {}]   ;;  %s215_s3 = inlined_call_operand.hbm [shape: f32[8,64], index: 3, kind: output, shape index: {}]  }
   0x1   :  { %v131_v0 = vld [vmem:[%s213_s1 + $0x18] sm:$0xff] }
   0x2   :  { %8 = vsyncpa [#allocation4], 0  ;;  %v66_v1 = vsel %vm52_vm0, %v131_v0, 0  ;;  %vm20_vm1 = vcmask 523264   ;;  %v130_v2 = vld [vmem:[%s213_s1 + $0x10] sm:$0xff]  ;;  %v161_v3 = vmov 0.0  }
   0x3   :  { %72 = vmatpush.bf16.xpose.msra.mxu0 %v66_v1  ;;  %21 = vst.msk [vmem:[#allocation2] sm:$0xff] %vm20_vm1, %v161_v3  ;;  %v63_v4 = vsel %vm52_vm0, %v130_v2, 0  ;;  %v129_v5 = vld [vmem:[%s213_s1 + $0x8] sm:$0xff]  ;;  %v128_v7 = vld [vmem:[%s213_s1] sm:$0xff]  ;;  %s162_s1 = smov [#allocation3]   ;;  %s102_s27 = sshll.u32 %s215_s3, 4  ;;  %s103_s27 = int_to_ptr.hbm [resolvable:$true] %s102_s27 }
   0x4   :  { %v60_v6 = vsel %vm52_vm0, %v129_v5, 0  ;;  %v57_v8 = vsel %vm52_vm0, %v128_v7, 0  ;;  %v23_v9 = vld [vmem:[%s212_s0] sm:$0xf]  ;;  %s100_s24 = sshll.u32 %s162_s1, 4  ;;  %s101_s24 = int_to_ptr.vmem [resolvable:$true] %s100_s24 }
   0x5   :  { %v134_v13 = vld [vmem:[%s214_s2] ss:$0 sm:$0xff] }
   0xa   :  { %v22_v10 = vld [vmem:[#allocation2] sm:$0xff] }
   0xb   :  { %73 = vmatpush.bf16.xpose.msra.mxu0 %v63_v4 }
  0x13   :  { %74 = vmatpush.bf16.xpose.msra.mxu0 %v60_v6 }
  0x1b   :  { %75 = vmatpush.bf16.xpose.msra.mxu0 %v57_v8 }
  0x22   :  { %127 = vmatmul.msk.bf16.vlgmr.msra.gmra.mxu0 %vm52_vm0, %v23_v9 }
  0x9f   :  { %v77_v11 = vpop.f32.mrf.mxu0 }
  0xa0   :  { %v81_v12 = vadd.f32 %v77_v11, %v22_v10 }
  0xa2   :  { %83 = vst.msk [vmem:[#allocation2] sm:$0xff] %vm20_vm1, %v81_v12 }
  0xa7   :  { %v79_v14 = vpop.f32.mrf.mxu0 }
  0xa9   :  { %v87_v15 = vld [vmem:[#allocation2] sm:$0xff] }
  0xaa   :  { %v92_v16 = vadd.f32 %v134_v13, %v87_v15 }
  0xac   :  { %v93_v17 = vmax.f32 %v92_v16, 0.0 }
  0xae   :  { %94 = vst.msk [vmem:[#allocation3] sm:$0xff] %vm20_vm1, %v93_v17 }
  0xaf   :  { %105 = dma.vmem_to_hbm [thread:$0]  %s101_s24, 128, %s103_s27, [#allocation4]  }
  0xb0   :  { %159 = dma.done.wait [#allocation4], 128  }
  0xb1   :  { %160 = vsyncadd [#allocation4], 4294967168 }
  0xb2   :  { %110 = vsyncpa [#allocation4], 1 }

</bundles_post_ra>
